<compile_context>
chip_gen: v7x
topology: tpu7x:2x2x1
jax: 0.10.0
libtpu: 0.0.40
codegen_flags: <defaults>
</compile_context>

<pallas_src>
import jax
import jax.numpy as jnp
from jax.experimental import pallas as pl
from jax.experimental.pallas import tpu as pltpu

BN_EPS = 1e-5
LANE = 128
SUBLANE = 8
_HEADROOM = 4 << 20  # compiler temporaries


def _round_up(n, m):
    return ((n + m - 1) // m) * m


def _vmem_cap_bytes():
    """VMEM ceiling we are willing to declare (safe on v5e / v6e / v7x)."""
    try:
        phys = int(pltpu.get_tpu_info().vmem_capacity_bytes)
    except Exception:
        phys = 64 << 20  # assume the smallest generation (v7x per-TC) if unknown
    return min(phys - (8 << 20), 100 << 20)


def _target_kernel(x_ref, w1_ref, b1_ref, w2_ref, b2_ref, o_ref):
    # x: [TB, L] (f32 or bf16) | w1: [L, HP] bf16 (BN folded) | b1: [1, HP] f32
    # w2: [HP, CP] bf16        | b2: [1, CP] f32              | o: [TB, CP]
    x = x_ref[...]
    if x.dtype != jnp.bfloat16:
        x = x.astype(jnp.bfloat16)           # bf16 MXU path, f32 accumulation
    h = jnp.dot(x, w1_ref[...], preferred_element_type=jnp.float32) + b1_ref[...]
    h = jnp.maximum(h, 0.0)                  # Dropout(eval)=identity; BN folded
    o_ref[...] = (jnp.dot(h.astype(jnp.bfloat16), w2_ref[...],
                          preferred_element_type=jnp.float32)
                  + b2_ref[...]).astype(o_ref.dtype)


def _pick_batch_tile(B, L, HP, CP, x_isz, o_isz, weight_bytes, vmem_cap):
    # Bytes of VMEM held live per batch row: double-buffered x and out tiles,
    # the in-kernel bf16 copy of x, and the h intermediate (f32 + bf16).
    per_row = 2 * L * x_isz + 2 * CP * o_isz + 2 * L + 6 * HP
    avail = max(vmem_cap - weight_bytes - _HEADROOM, SUBLANE * per_row)
    tb = (avail // per_row) // SUBLANE * SUBLANE
    tb = max(SUBLANE, min(1024, tb))
    b_pad = _round_up(B, SUBLANE)
    if tb >= b_pad:
        # Whole batch would fit in one tile: split into >=2 grid steps so both
        # v7x TensorCores get work under dimension_semantics=("parallel",).
        tb = max(SUBLANE, _round_up(pl.cdiv(B, 2), SUBLANE))
    return min(tb, b_pad)


def classification_target_forward(x, prepared, *, out_dtype=jnp.float32,
                                  return_padded=False):
    """x: [B, L] (float32 or bfloat16) -> [B, num_classes] logits (eval mode).

    Pass bf16 x from the producer to halve the dominant HBM read.  Pass
    return_padded=True to receive the lane-padded [B, CP] result and slice at
    the consumer (inside the same jit) instead of paying a separate slice pass.
    """
    B, L = x.shape
    w1, b1, w2, b2 = prepared["w1"], prepared["b1"], prepared["w2"], prepared["b2"]
    C = prepared["num_classes"]
    HP = w1.shape[1]
    CP = w2.shape[1]

    weight_bytes = w1.size * 2 + w2.size * 2 + (HP + CP) * 4 * SUBLANE
    vmem_cap = _vmem_cap_bytes()
    if weight_bytes > vmem_cap // 2:
        # TODO(synk): implement a K-reduction grid axis over L (f32 accumulator,
        # pl.when init/finalize) instead of fully resident w1 for huge L*H.
        raise ValueError(
            f"Resident-weight design needs a K-reduction axis: weights are "
            f"{weight_bytes} bytes vs VMEM cap {vmem_cap}.")

    x_isz = jnp.dtype(x.dtype).itemsize
    o_isz = jnp.dtype(out_dtype).itemsize
    tb = _pick_batch_tile(B, L, HP, CP, x_isz, o_isz, weight_bytes, vmem_cap)
    nb = pl.cdiv(B, tb)

    def build(single_buffer_weights):
        if single_buffer_weights:
            # Grid-invariant operands: no need for double buffers.
            resident = lambda s: pl.BlockSpec(s, lambda i: (0,) * len(s),
                                              pipeline_mode=pl.Buffered(1))
            wbuf = 1
        else:
            resident = lambda s: pl.BlockSpec(s, lambda i: (0,) * len(s))
            wbuf = 2
        vmem_bytes = (2 * tb * L * x_isz        # double-buffered x tile
                      + 2 * tb * CP * o_isz     # double-buffered out tile
                      + 2 * tb * L              # in-kernel bf16 copy of x
                      + 6 * tb * HP             # h intermediate (f32 + bf16)
                      + wbuf * weight_bytes     # resident weights/biases
                      + _HEADROOM)
        vmem_limit = int(min(max(vmem_bytes, 8 << 20), vmem_cap))
        return pl.pallas_call(
            _target_kernel,
            out_shape=jax.ShapeDtypeStruct((B, CP), out_dtype),
            grid=(nb,),
            in_specs=[
                pl.BlockSpec((tb, L), lambda i: (i, 0)),  # streamed batch tiles
                resident((L, HP)),                         # VMEM-resident weights
                resident((1, HP)),
                resident((HP, CP)),
                resident((1, CP)),
            ],
            out_specs=pl.BlockSpec((tb, CP), lambda i: (i, 0)),
            compiler_params=pltpu.CompilerParams(
                dimension_semantics=("parallel",),   # megacore sharding on v7x
                vmem_limit_bytes=vmem_limit),
            cost_estimate=pl.CostEstimate(
                flops=2 * B * L * HP + 2 * B * HP * CP,
                transcendentals=0,
                bytes_accessed=(x_isz * B * L + 2 * L * HP + 2 * HP * CP
                                + 4 * (HP + CP) + o_isz * B * CP)),
        )

    try:
        out_padded = build(True)(x, w1, b1, w2, b2)
    except Exception:
        # pl.Buffered(1) not supported on this jax version -> default buffering.
        out_padded = build(False)(x, w1, b1, w2, b2)

    if return_padded:
        return out_padded
    return out_padded[:, :C]


def init_params(key, input_size, hidden_size, num_classes):
    """PyTorch-layout params (weights stored transposed: [in, out])."""
    k1, k2, k3, k4, k5, k6, k7 = jax.random.split(key, 7)
    bound1 = 1.0 / (input_size ** 0.5)
    bound2 = 1.0 / (hidden_size ** 0.5)
    return {
        "w1": jax.random.uniform(k1, (input_size, hidden_size), jnp.float32,
                                 -bound1, bound1),
        "b1": jax.random.uniform(k2, (1, hidden_size), jnp.float32,
                                 -bound1, bound1),
        # Non-trivial BN state so the offline fold is actually exercised.
        "gamma": 1.0 + 0.1 * jax.random.normal(k5, (1, hidden_size), jnp.float32),
        "beta": 0.1 * jax.random.normal(k6, (1, hidden_size), jnp.float32),
        "running_mean": 0.1 * jax.random.normal(k7, (1, hidden_size), jnp.float32),
        "running_var": 1.2 * jnp.ones((1, hidden_size), jnp.float32),
        "w2": jax.random.uniform(k3, (hidden_size, num_classes), jnp.float32,
                                 -bound2, bound2),
        "b2": jax.random.uniform(k4, (1, num_classes), jnp.float32,
                                 -bound2, bound2),
    }


def prepare_params(params):
    """Fold eval-mode BN into Linear1, cast weights to bf16, lane-pad H and C."""
    scale = params["gamma"] * jax.lax.rsqrt(params["running_var"] + BN_EPS)  # [1,H]
    w1f = params["w1"] * scale
    b1f = (params["b1"] - params["running_mean"]) * scale + params["beta"]

    w2, b2 = params["w2"], params["b2"]
    H, C = w2.shape
    L = w1f.shape[0]
    HP = _round_up(H, LANE)   # lane-dense hidden dim (unmasked layouts, MXU fill)
    CP = _round_up(C, LANE)   # lane-dense output stores
    w1p = jnp.zeros((L, HP), jnp.bfloat16).at[:, :H].set(w1f.astype(jnp.bfloat16))
    b1p = jnp.zeros((1, HP), jnp.float32).at[:, :H].set(b1f.astype(jnp.float32))
    w2p = jnp.zeros((HP, CP), jnp.bfloat16).at[:H, :C].set(w2.astype(jnp.bfloat16))
    b2p = jnp.zeros((1, CP), jnp.float32).at[:, :C].set(b2)
    return {"w1": w1p, "b1": b1p, "w2": w2p, "b2": b2p, "num_classes": C}


def reference_module_forward(x, p):
    """Eval-mode semantics of the PyTorch module, pure f32 (no fold, no bf16)."""
    h = x.astype(jnp.float32) @ p["w1"] + p["b1"]
    h = (h - p["running_mean"]) * jax.lax.rsqrt(p["running_var"] + BN_EPS)
    h = h * p["gamma"] + p["beta"]
    h = jnp.maximum(h, 0.0)
    return h @ p["w2"] + p["b2"]


def reference_prepared_forward(x, prepared):
    """Same numerics the kernel sees (folded + bf16 weights/activations)."""
    C = prepared["num_classes"]
    xb = x.astype(jnp.bfloat16).astype(jnp.float32)
    h = jnp.maximum(xb @ prepared["w1"].astype(jnp.float32) + prepared["b1"], 0.0)
    hb = h.astype(jnp.bfloat16).astype(jnp.float32)
    out = hb @ prepared["w2"].astype(jnp.float32) + prepared["b2"]
    return out[:, :C]


if __name__ == "__main__":
    # Small shapes consistent with the module (B x L latent in -> B x C logits).
    # B=16 gives >=2 batch tiles, exercising the pipelined / megacore path.
    B, L, H, C = 16, 128, 32, 2

    key = jax.random.PRNGKey(0)
    kx, kp = jax.random.split(key)
    x = jax.random.normal(kx, (B, L), jnp.float32)
    params = init_params(kp, input_size=L, hidden_size=H, num_classes=C)
    prepared = prepare_params(params)

    out = classification_target_forward(x, prepared)
    out = jax.block_until_ready(out)
    assert out.shape == (B, C)

    # Tight check against the exact numerics the kernel consumes.
    ref_tight = reference_prepared_forward(x, prepared)
    assert jnp.allclose(out, ref_tight, atol=2e-2, rtol=2e-2), \
        "mismatch vs folded/bf16 reference"

    # Semantics check against the pure-f32 module math (BN fold + bf16 error only).
    # NOTE: logits carry bf16-level quantization error; document for consumers
    # that need calibrated raw logits.
    ref_module = reference_module_forward(x, params)
    assert jnp.allclose(out, ref_module, atol=8e-2, rtol=8e-2), \
        "mismatch vs module-semantics reference"

    # Dtype-polymorphic path: bf16 x from the producer (halves x HBM traffic).
    out_bf16_in = classification_target_forward(x.astype(jnp.bfloat16), prepared)
    out_bf16_in = jax.block_until_ready(out_bf16_in)
    assert jnp.allclose(out_bf16_in, out, atol=1e-5, rtol=1e-5), \
        "bf16-input path mismatch"

    print("KERNEL_OK")
</pallas_src>

<mosaic_0001>
module attributes {stable_mosaic.version = 11 : i64} {
  func.func @_target_kernel(%arg0: i32, %arg1: memref<8x128xf32, #tpu.memory_space<vmem>>, %arg2: memref<128x128xbf16, #tpu.memory_space<vmem>>, %arg3: memref<1x128xf32, #tpu.memory_space<vmem>>, %arg4: memref<128x128xbf16, #tpu.memory_space<vmem>>, %arg5: memref<1x128xf32, #tpu.memory_space<vmem>>, %arg6: memref<8x128xf32, #tpu.memory_space<vmem>>) attributes {dimension_semantics = [#tpu.dimension_semantics<parallel>], iteration_bounds = array<i64: 2>, scalar_prefetch = 0 : i64, scratch_operands = 0 : i64, tpu.core_type = #tpu.core_type<tc>, window_params = [{transform_indices = @transform_0, window_bounds = array<i64: 8, 128>}, {pipeline_mode = #tpu.pipeline_mode<synchronous>, transform_indices = @transform_1, window_bounds = array<i64: 128, 128>}, {pipeline_mode = #tpu.pipeline_mode<synchronous>, transform_indices = @transform_2, window_bounds = array<i64: 1, 128>}, {pipeline_mode = #tpu.pipeline_mode<synchronous>, transform_indices = @transform_3, window_bounds = array<i64: 128, 128>}, {pipeline_mode = #tpu.pipeline_mode<synchronous>, transform_indices = @transform_4, window_bounds = array<i64: 1, 128>}, {transform_indices = @transform_5, window_bounds = array<i64: 8, 128>}]} {
    %c0 = arith.constant 0 : index
    %c0_0 = arith.constant 0 : index
    %0 = vector.load %arg1[%c0, %c0_0] : memref<8x128xf32, #tpu.memory_space<vmem>>, vector<8x128xf32>
    %1 = arith.truncf %0 : vector<8x128xf32> to vector<8x128xbf16>
    %c0_1 = arith.constant 0 : index
    %c0_2 = arith.constant 0 : index
    %2 = vector.load %arg2[%c0_1, %c0_2] : memref<128x128xbf16, #tpu.memory_space<vmem>>, vector<128x128xbf16>
    %cst = arith.constant dense<0.000000e+00> : vector<8x128xf32>
    %3 = tpu.matmul %1, %2, %cst {dimension_numbers = #tpu.dot_dimension_numbers<[1], [0], [0], [1], [0, 0, 1, 1], [], []>} : vector<8x128xbf16>, vector<128x128xbf16>, vector<8x128xf32> -> vector<8x128xf32>
    %c0_3 = arith.constant 0 : index
    %c0_4 = arith.constant 0 : index
    %4 = vector.load %arg3[%c0_3, %c0_4] : memref<1x128xf32, #tpu.memory_space<vmem>>, vector<1x128xf32>
    %5 = vector.broadcast %4 : vector<1x128xf32> to vector<8x128xf32>
    %6 = arith.addf %3, %5 : vector<8x128xf32>
    %cst_5 = arith.constant 0.000000e+00 : f32
    %7 = vector.broadcast %cst_5 : f32 to vector<8x128xf32>
    %8 = arith.maximumf %6, %7 : vector<8x128xf32>
    %9 = arith.truncf %8 : vector<8x128xf32> to vector<8x128xbf16>
    %c0_6 = arith.constant 0 : index
    %c0_7 = arith.constant 0 : index
    %10 = vector.load %arg4[%c0_6, %c0_7] : memref<128x128xbf16, #tpu.memory_space<vmem>>, vector<128x128xbf16>
    %cst_8 = arith.constant dense<0.000000e+00> : vector<8x128xf32>
    %11 = tpu.matmul %9, %10, %cst_8 {dimension_numbers = #tpu.dot_dimension_numbers<[1], [0], [0], [1], [0, 0, 1, 1], [], []>} : vector<8x128xbf16>, vector<128x128xbf16>, vector<8x128xf32> -> vector<8x128xf32>
    %c0_9 = arith.constant 0 : index
    %c0_10 = arith.constant 0 : index
    %12 = vector.load %arg5[%c0_9, %c0_10] : memref<1x128xf32, #tpu.memory_space<vmem>>, vector<1x128xf32>
    %13 = vector.broadcast %12 : vector<1x128xf32> to vector<8x128xf32>
    %14 = arith.addf %11, %13 : vector<8x128xf32>
    %c0_11 = arith.constant 0 : index
    %c0_12 = arith.constant 0 : index
    %15 = vector.load %arg6[%c0_11, %c0_12] : memref<8x128xf32, #tpu.memory_space<vmem>>, vector<8x128xf32>
    tpu.vector_store %arg6[%c0_11, %c0_12], %14 {strides = array<i32>} : memref<8x128xf32, #tpu.memory_space<vmem>>, vector<8x128xf32>,
    return
  }
  func.func @transform_0(%arg0: i32) -> (i32, i32) {
    %c0_i32 = arith.constant 0 : i32
    %c0_i32_0 = arith.constant 0 : i32
    return %arg0, %c0_i32 : i32, i32
  }
  func.func @transform_1(%arg0: i32) -> (i32, i32) {
    %c0_i32 = arith.constant 0 : i32
    %c0_i32_0 = arith.constant 0 : i32
    %c0_i32_1 = arith.constant 0 : i32
    return %c0_i32, %c0_i32_0 : i32, i32
  }
  func.func @transform_2(%arg0: i32) -> (i32, i32) {
    %c0_i32 = arith.constant 0 : i32
    %c0_i32_0 = arith.constant 0 : i32
    %c0_i32_1 = arith.constant 0 : i32
    return %c0_i32, %c0_i32_0 : i32, i32
  }
  func.func @transform_3(%arg0: i32) -> (i32, i32) {
    %c0_i32 = arith.constant 0 : i32
    %c0_i32_0 = arith.constant 0 : i32
    %c0_i32_1 = arith.constant 0 : i32
    return %c0_i32, %c0_i32_0 : i32, i32
  }
  func.func @transform_4(%arg0: i32) -> (i32, i32) {
    %c0_i32 = arith.constant 0 : i32
    %c0_i32_0 = arith.constant 0 : i32
    %c0_i32_1 = arith.constant 0 : i32
    return %c0_i32, %c0_i32_0 : i32, i32
  }
  func.func @transform_5(%arg0: i32) -> (i32, i32) {
    %c0_i32 = arith.constant 0 : i32
    %c0_i32_0 = arith.constant 0 : i32
    return %arg0, %c0_i32 : i32, i32
  }
}

module attributes {stable_mosaic.version = 11 : i64} {
  func.func @_target_kernel(%arg0: i32, %arg1: memref<8x128xf32, #tpu.memory_space<vmem>>, %arg2: memref<128x128xbf16, #tpu.memory_space<vmem>>, %arg3: memref<1x128xf32, #tpu.memory_space<vmem>>, %arg4: memref<128x128xbf16, #tpu.memory_space<vmem>>, %arg5: memref<1x128xf32, #tpu.memory_space<vmem>>, %arg6: memref<8x128xf32, #tpu.memory_space<vmem>>) attributes {dimension_semantics = [#tpu.dimension_semantics<parallel>], iteration_bounds = array<i64: 2>, scalar_prefetch = 0 : i64, scratch_operands = 0 : i64, tpu.core_type = #tpu.core_type<tc>, window_params = [{transform_indices = @transform_0, window_bounds = array<i64: 8, 128>}, {pipeline_mode = #tpu.pipeline_mode<synchronous>, transform_indices = @transform_1, window_bounds = array<i64: 128, 128>}, {pipeline_mode = #tpu.pipeline_mode<synchronous>, transform_indices = @transform_2, window_bounds = array<i64: 1, 128>}, {pipeline_mode = #tpu.pipeline_mode<synchronous>, transform_indices = @transform_3, window_bounds = array<i64: 128, 128>}, {pipeline_mode = #tpu.pipeline_mode<synchronous>, transform_indices = @transform_4, window_bounds = array<i64: 1, 128>}, {transform_indices = @transform_5, window_bounds = array<i64: 8, 128>}]} {
    %c0 = arith.constant 0 : index
    %c0_0 = arith.constant 0 : index
    %0 = vector.load %arg1[%c0, %c0_0] : memref<8x128xf32, #tpu.memory_space<vmem>>, vector<8x128xf32>
    %1 = arith.truncf %0 : vector<8x128xf32> to vector<8x128xbf16>
    %c0_1 = arith.constant 0 : index
    %c0_2 = arith.constant 0 : index
    %2 = vector.load %arg2[%c0_1, %c0_2] : memref<128x128xbf16, #tpu.memory_space<vmem>>, vector<128x128xbf16>
    %cst = arith.constant dense<0.000000e+00> : vector<8x128xf32>
    %3 = tpu.matmul %1, %2, %cst {dimension_numbers = #tpu.dot_dimension_numbers<[1], [0], [0], [1], [0, 0, 1, 1], [], []>} : vector<8x128xbf16>, vector<128x128xbf16>, vector<8x128xf32> -> vector<8x128xf32>
    %c0_3 = arith.constant 0 : index
    %c0_4 = arith.constant 0 : index
    %4 = vector.load %arg3[%c0_3, %c0_4] : memref<1x128xf32, #tpu.memory_space<vmem>>, vector<1x128xf32>
    %5 = vector.broadcast %4 : vector<1x128xf32> to vector<8x128xf32>
    %6 = arith.addf %3, %5 : vector<8x128xf32>
    %cst_5 = arith.constant 0.000000e+00 : f32
    %7 = vector.broadcast %cst_5 : f32 to vector<8x128xf32>
    %8 = arith.maximumf %6, %7 : vector<8x128xf32>
    %9 = arith.truncf %8 : vector<8x128xf32> to vector<8x128xbf16>
    %c0_6 = arith.constant 0 : index
    %c0_7 = arith.constant 0 : index
    %10 = vector.load %arg4[%c0_6, %c0_7] : memref<128x128xbf16, #tpu.memory_space<vmem>>, vector<128x128xbf16>
    %cst_8 = arith.constant dense<0.000000e+00> : vector<8x128xf32>
    %11 = tpu.matmul %9, %10, %cst_8 {dimension_numbers = #tpu.dot_dimension_numbers<[1], [0], [0], [1], [0, 0, 1, 1], [], []>} : vector<8x128xbf16>, vector<128x128xbf16>, vector<8x128xf32> -> vector<8x128xf32>
    %c0_9 = arith.constant 0 : index
    %c0_10 = arith.constant 0 : index
    %12 = vector.load %arg5[%c0_9, %c0_10] : memref<1x128xf32, #tpu.memory_space<vmem>>, vector<1x128xf32>
    %13 = vector.broadcast %12 : vector<1x128xf32> to vector<8x128xf32>
    %14 = arith.addf %11, %13 : vector<8x128xf32>
    %c0_11 = arith.constant 0 : index
    %c0_12 = arith.constant 0 : index
    %15 = vector.load %arg6[%c0_11, %c0_12] : memref<8x128xf32, #tpu.memory_space<vmem>>, vector<8x128xf32>
    tpu.vector_store %arg6[%c0_11, %c0_12], %14 {strides = array<i32>} : memref<8x128xf32, #tpu.memory_space<vmem>>, vector<8x128xf32>,
    return
  }
  func.func @transform_0(%arg0: i32) -> (i32, i32) {
    %c0_i32 = arith.constant 0 : i32
    %c0_i32_0 = arith.constant 0 : i32
    return %arg0, %c0_i32 : i32, i32
  }
  func.func @transform_1(%arg0: i32) -> (i32, i32) {
    %c0_i32 = arith.constant 0 : i32
    %c0_i32_0 = arith.constant 0 : i32
    %c0_i32_1 = arith.constant 0 : i32
    return %c0_i32, %c0_i32_0 : i32, i32
  }
  func.func @transform_2(%arg0: i32) -> (i32, i32) {
    %c0_i32 = arith.constant 0 : i32
    %c0_i32_0 = arith.constant 0 : i32
    %c0_i32_1 = arith.constant 0 : i32
    return %c0_i32, %c0_i32_0 : i32, i32
  }
  func.func @transform_3(%arg0: i32) -> (i32, i32) {
    %c0_i32 = arith.constant 0 : i32
    %c0_i32_0 = arith.constant 0 : i32
    %c0_i32_1 = arith.constant 0 : i32
    return %c0_i32, %c0_i32_0 : i32, i32
  }
  func.func @transform_4(%arg0: i32) -> (i32, i32) {
    %c0_i32 = arith.constant 0 : i32
    %c0_i32_0 = arith.constant 0 : i32
    %c0_i32_1 = arith.constant 0 : i32
    return %c0_i32, %c0_i32_0 : i32, i32
  }
  func.func @transform_5(%arg0: i32) -> (i32, i32) {
    %c0_i32 = arith.constant 0 : i32
    %c0_i32_0 = arith.constant 0 : i32
    return %arg0, %c0_i32 : i32, i32
  }
}

</mosaic_0001>

<bundles_post_ra>
// kernel: tpu_custom_call.1
= control target key start
LH: loop header
LB: loop body
LE: loop exit
PB: predicated region body
PF: predicated region fallthrough
CT: control target
= control target key end

     0   :  { %10 = vsyncpa [#allocation3], 0  ;;  %s1217_s0 = inlined_call_operand.hbm [shape: f32[16,128], index: 0, kind: input, shape index: {}]   ;;  %s1218_s1 = inlined_call_operand.hbm [shape: bf16[128,128], index: 1, kind: input, shape index: {}]   ;;  %s1219_s2 = inlined_call_operand.vmem [shape: f32[1,128], index: 2, kind: input, shape index: {}]   ;;  %s1220_s3 = inlined_call_operand.hbm [shape: bf16[128,128], index: 3, kind: input, shape index: {}]   ;;  %s1221_s4 = inlined_call_operand.vmem [shape: f32[1,128], index: 4, kind: input, shape index: {}]   ;;  %s1222_s5 = inlined_call_operand.hbm [shape: f32[16,128], index: 5, kind: output, shape index: {}]  }
   0x1   :  { %12 = vsyncpa [#allocation3 + $0x1], 0 }
   0x2   :  { %13 = vsyncpa [#allocation6], 0 }
   0x3   :  { %14 = vsyncpa [#allocation4], 0 }
   0x4   :  { %16 = vsyncpa [#allocation4 + $0x1], 0  ;;  %s975_s18 = smov 0   ;;  %s977_s19 = smov 0  }
   0x5   :  { %s979_s20 = smov 0   ;;  %s981_s21 = smov 0  }
   0x6 LB: > { %s996_s22 = sadd.s32 4294967295, %s935_s21   ;;  %s600_s23 = sadd.s32 4294967294, %s935_s21   ;;  %s935_s21 = sphi %s981_s21, %s1242_s21   ;;  %s931_s20 = sphi %s979_s20, %s1241_s20   ;;  %s927_s19 = sphi %s977_s19, %s1240_s19   ;;  %s923_s18 = sphi %s975_s18, %s1239_s18  }
   0x7   : > { %p42_p0 = scmp.ne.s32.totalorder %s927_s19, %s923_s18  ;;  %p1223_p1 = scmp.eq.s32.totalorder %s996_s22, 0 }
   0x8   : > { %p156_p3 = scmp.eq.s32.totalorder %s600_s23, 1  ;;  %p601_p5 = scmp.ge.s32.totalorder %s935_s21, 1 }
   0x9   : > { %p1005_p4 = por %p1223_p1, %p42_p0  ;;  %p163_p7 = scmp.lt.s32.totalorder %s935_s21, 3 }
   0xa   : > { %p1010_p6 = por %p156_p3, %p42_p0  ;;  %s937_s27 = smov [#allocation5]  }
   0xb   : > { %s1226_s24 = scalar_select %p1005_p4, 1, 0 }
   0xc   : > { %s1227_s25 = scalar_select %p1010_p6, 1, 0 }
   0xd   : > { %p1015_p8 = pnand %p601_p5, %p163_p7  ;;  %s175_s28 = sshll.u32 %s937_s27, 4  ;;  %s1019_s28 = int_to_ptr.vmem [resolvable:$true] %s175_s28 }
   0xe   : > { %s938_s30 = smov [#allocation7]   ;;  %s779_s9 = scalar_lea.hbm %s1218_s1, 1024 }
   0xf   : > { %p704_p9 = pneg %p1015_p8  ;;  %s191_s6 = sshll.u32 %s938_s30, 4  ;;  %s1030_s6 = int_to_ptr.vmem [resolvable:$true] %s191_s6 }
  0x10   : > { %p780_p12 = scmp.ne.s32.totalorder %s1218_s1, %s779_s9  ;;  %p786_p5 = scmp.lt.u32.totalorder %s779_s9, %s1218_s1 }
  0x11   : > { %p1026_p11 = pnand %p704_p9, %p1223_p1 }
  0x13   : > { %p781_p13 = pneg %p1026_p11 }
  0x15   : > { %p782_p0 = pnand %p781_p13, %p780_p12 }
  0x17   : > { %p783_p3 = pneg %p782_p0 }
  0x19   : > { %p788_p7 = pnand %p786_p5, %p783_p3 }
  0x1b   : > { %791 = shalt.err (!%p788_p7)
}
  0x1c   : > { %s792_s14 = scalar_lea.vmem %s1019_s28, 1024  ;;  %p800_p2 = scmp.lt.s32.totalorder %s1019_s28, %s1019_s28 }
  0x1d   : > { %p793_p9 = scmp.ne.s32.totalorder %s1019_s28, %s792_s14  ;;  %p801_p12 = scmp.lt.s32.totalorder %s792_s14, %s792_s14 }
  0x1f   : > { %p795_p10 = pnand %p793_p9, %p781_p13  ;;  %p802_p0 = por %p801_p12, %p800_p2 }
  0x21   : > { %p796_p1 = pneg %p795_p10 }
  0x23   : > { %p803_p6 = pnand %p802_p0, %p796_p1 }
  0x25   : > { %806 = shalt.err (!%p803_p6)
}
  0x26   : > { %s939_s15 = smov 64   ;;  %s940_s16 = smov 4  }
  0x27   : > { %707 = dma.hbm_to_vmem [thread:$0]  (!%p1026_p11), %s1218_s1, 1024, %s1019_s28, [#allocation6], %s939_s15, %s939_s15, %s940_s16  }
  0x28   : > { %s807_s7 = scalar_lea.hbm %s1220_s3, 1024 }
  0x29   : > { %p808_p2 = scmp.ne.s32.totalorder %s1220_s3, %s807_s7  ;;  %p814_p10 = scmp.lt.u32.totalorder %s807_s7, %s1220_s3 }
  0x2b   : > { %p810_p1 = pnand %p808_p2, %p781_p13 }
  0x2d   : > { %p811_p6 = pneg %p810_p1 }
  0x2f   : > { %p816_p3 = pnand %p814_p10, %p811_p6 }
  0x31   : > { %819 = shalt.err (!%p816_p3)
}
  0x32   : > { %s820_s28 = scalar_lea.vmem %s1030_s6, 1024  ;;  %p828_p12 = scmp.lt.s32.totalorder %s1030_s6, %s1030_s6 }
  0x33   : > { %p821_p5 = scmp.ne.s32.totalorder %s1030_s6, %s820_s28  ;;  %p829_p0 = scmp.lt.s32.totalorder %s820_s28, %s820_s28 }
  0x35   : > { %p823_p7 = pnand %p821_p5, %p781_p13  ;;  %p830_p2 = por %p829_p0, %p828_p12 }
  0x37   : > { %p824_p9 = pneg %p823_p7 }
  0x39   : > { %p831_p1 = pnand %p830_p2, %p824_p9 }
  0x3b   : > { %834 = shalt.err (!%p831_p1)
}
  0x3c   : > { %710 = dma.hbm_to_vmem [thread:$0]  (!%p1026_p11), %s1220_s3, 1024, %s1030_s6, [#allocation6], %s939_s15, %s939_s15, %s940_s16  }
  0x3d   : > { %s1085_s14 = sadd.s32 1, %s935_s21   ;;  %s29_s29 = sadd.s32 1, %s931_s20 }
  0x3e   : > { %s26_s17 = ssub.s32 %s935_s21, %s1085_s14  ;;  %p36_p13 = scmp.ne.s32.totalorder %s931_s20, %s927_s19 }
  0x3f   : > { %p27_p6 = scmp.eq.s32.totalorder %s26_s17, 0  ;;  %p37_p10 = scmp.eq.s32.totalorder %s935_s21, 0 }
  0x40   : > { %p1230_p3 = scmp.eq.s32.totalorder %s996_s22, 1  ;;  %p721_p7 = scmp.lt.s32.totalorder %s935_s21, 2 }
  0x41   : > { %s1101_s27 = scalar_select %p27_p6, %s931_s20, %s29_s29  }
  0x42   : > { %p1095_p5 = por %p1230_p3, %p36_p13  ;;  %p38_p9 = por %p37_p10, %p36_p13 }
  0x43   : > { %s208_s30 = sand.u32 1, %s931_s20   ;;  %s606_s6 = sshll.u32 %s935_s21, 7 }
  0x44   : > { %s1231_s23 = scalar_select %p1095_p5, 1, 0 }
  0x45   : > { %s605_s7 = sshll.u32 %s208_s30, 3  ;;  %s1108_s8 = scalar_lea.hbm %s1217_s0, %s606_s6 }
  0x46   : > { %s212_s9 = scalar_lea.vmem [#allocation2], %s605_s7  ;;  %p1112_p11 = pnand %p721_p7, %p38_p9 }
  0x47   : > { %s219_s10 = sshll.u32 %s212_s9, 4  ;;  %s209_s28 = scalar_lea.sflag [#allocation3], %s208_s30  ;;  %s1110_s10 = int_to_ptr.vmem [resolvable:$true] %s219_s10 }
  0x48   : > { %s835_s12 = scalar_lea.hbm %s1108_s8, 128  ;;  %p837_p0 = pneg %p1112_p11 }
  0x49   : > { %p836_p12 = scmp.ne.s32.totalorder %s1108_s8, %s835_s12  ;;  %s840_s17 = scalar_lea.hbm %s1217_s0, 256 }
  0x4a   : > { %p841_p13 = scmp.lt.u32.totalorder %s1108_s8, %s1217_s0  ;;  %p842_p6 = scmp.lt.u32.totalorder %s840_s17, %s835_s12 }
  0x4b   : > { %p838_p2 = pnand %p837_p0, %p836_p12  ;;  %p844_p3 = scmp.lt.u32.totalorder %s835_s12, %s1108_s8 }
  0x4c   : > { %p843_p10 = por %p842_p6, %p841_p13 }
  0x4d   : > { %p839_p1 = pneg %p838_p2 }
  0x4e   : > { %p845_p7 = por %p844_p3, %p843_p10 }
  0x50   : > { %p846_p9 = pnand %p845_p7, %p839_p1 }
  0x52   : > { %849 = shalt.err (!%p846_p9)
}
  0x53   : > { %s850_s30 = scalar_lea.vmem %s1110_s10, 128  ;;  %s941_s15 = smov [#allocation2]  }
  0x54   : > { %p851_p12 = scmp.ne.s32.totalorder %s1110_s10, %s850_s30  ;;  %s855_s16 = sshll.u32 %s941_s15, 4  ;;  %s856_s16 = int_to_ptr.vmem [resolvable:$false] %s855_s16 }
  0x55   : > { %s857_s9 = scalar_lea.vmem %s856_s16, 256  ;;  %p858_p4 = scmp.lt.s32.totalorder %s1110_s10, %s856_s16 }
  0x56   : > { %p853_p2 = pnand %p851_p12, %p837_p0  ;;  %p859_p13 = scmp.lt.s32.totalorder %s857_s9, %s850_s30 }
  0x58   : > { %p854_p5 = pneg %p853_p2  ;;  %p860_p6 = por %p859_p13, %p858_p4 }
  0x5a   : > { %p861_p10 = pnand %p860_p6, %p854_p5 }
  0x5c   : > { %864 = shalt.err (!%p861_p10)
}
  0x5d   : > { %714 = dma.hbm_to_vmem [thread:$0]  (!%p1112_p11), %s1108_s8, 128, %s1110_s10, %s209_s28  }
  0x5e   : > { %228 = sbr.rel (%p1015_p8) target bundleno = 585 (0x249), region = 40  ;;  %s1144_s12 = sand.u32 (!%p1015_p8), 1, %s927_s19  }
  0x5f   : > { %s608_s13 = sshll.u32 (!%p1015_p8), %s1144_s12, 3  ;;  %s231_s29 = scalar_lea.sflag (!%p1015_p8), [#allocation3], %s1144_s12 }
  0x60   : > { %s1150_s17 = scalar_lea.vmem (!%p1015_p8), [#allocation2], %s608_s13  ;;  %p1233_p4 = scmp.ne.s32.totalorder (!%p1015_p8), %s1226_s24, 0 }
  0x65   : > { %910 = dma.done.wait (%p1233_p4), %s231_s29, 128  }
  0x66   : > { %912 = vsyncadd (%p1233_p4), %s231_s29, 4294967168  ;;  %p1234_p5 = scmp.eq.s32.totalorder %s996_s22, 0 }
  0x68   : > { %914 = dma.done.wait (%p1234_p5), [#allocation6], 2048   ;;  %p1235_p8 = pmov %p1234_p5 }
  0x69   : > { %v942_v0 = vmov 0.0   ;;  %vm943_vm0 = vmmov 0   ;;  %v763_v1 = vld [vmem:[#allocation5] sm:$0xff]   ;;  %v764_v2 = vld [vmem:[#allocation5 + $0x8] sm:$0xff]   ;;  %v765_v3 = vld [vmem:[#allocation5 + $0x10] sm:$0xff]   ;;  %s631_s11 = sshll.u32 %s996_s22, 7 }
  0x6a   : > { %916 = vsyncadd (%p1235_p8), [#allocation6], 4294965248  ;;  %652 = vmatprep.subr.bf16.mxu0 %v942_v0  ;;  %668 = vmatprep.mubr.msk.bf16.mxu0 %vm943_vm0, %v942_v0  ;;  %v771_v4 = vld [vmem:[#allocation7] sm:$0xff]   ;;  %v766_v5 = vld [vmem:[#allocation5 + $0x18] sm:$0xff]   ;;  %s268_s28 = scalar_lea.vmem [#allocation8], %s608_s13  ;;  %s1173_s15 = scalar_lea.hbm %s1222_s5, %s631_s11 }
  0x6b   : > { %672 = vmatprep.subr.bf16.mxu1 %v942_v0  ;;  %688 = vmatprep.mubr.msk.bf16.mxu1 %vm943_vm0, %v942_v0  ;;  %v772_v6 = vld [vmem:[#allocation7 + $0x8] sm:$0xff]   ;;  %v767_v7 = vld [vmem:[#allocation5 + $0x20] sm:$0xff]   ;;  %v773_v8 = vld [vmem:[#allocation7 + $0x10] sm:$0xff]   ;;  %s511_s7 = sshll.u32 %s268_s28, 4  ;;  %s498_s22 = scalar_lea.sflag [#allocation4], %s1144_s12  ;;  %s1175_s7 = int_to_ptr.vmem [resolvable:$true] %s511_s7 }
  0x6c   : > { %653 = vmatpush3.bf16.msra.mxu0 %v763_v1  ;;  %673 = vmatpush3.bf16.msra.mxu1 %v771_v4  ;;  %v768_v9 = vld [vmem:[#allocation5 + $0x28] sm:$0xff]   ;;  %v774_v10 = vld [vmem:[#allocation7 + $0x18] sm:$0xff]   ;;  %v769_v11 = vld [vmem:[#allocation5 + $0x30] sm:$0xff]   ;;  %s865_s16 = scalar_lea.vmem %s1175_s7, 128  ;;  %p1236_p0 = scmp.ne.s32.totalorder %s1231_s23, 0 }
  0x6d   : > { %654 = vmatprep.subr.bf16.mxu0 %v942_v0  ;;  %674 = vmatprep.subr.bf16.mxu1 %v942_v0  ;;  %v775_v12 = vld [vmem:[#allocation7 + $0x20] sm:$0xff]   ;;  %v770_v13 = vld [vmem:[#allocation5 + $0x38] sm:$0xff]   ;;  %v776_v15 = vld [vmem:[#allocation7 + $0x28] sm:$0xff]   ;;  %p866_p11 = scmp.ne.s32.totalorder %s1175_s7, %s865_s16  ;;  %s944_s9 = smov [#allocation8]  }
  0x6e   : > { %v270_v14 = vld [vmem:[%s1150_s17] sm:$0xff]  ;;  %s869_s13 = sshll.u32 %s944_s9, 4  ;;  %s870_s13 = int_to_ptr.vmem [resolvable:$false] %s869_s13 }
  0x6f   : > { %v271_v16 = vpack.c.bf16 %v270_v14, %v270_v14  ;;  %v777_v17 = vld [vmem:[#allocation7 + $0x30] sm:$0xff]   ;;  %v778_v18 = vld [vmem:[#allocation7 + $0x38] sm:$0xff]   ;;  %p867_p1 = pnand %p866_p11, %p1236_p0  ;;  %s871_s29 = scalar_lea.vmem %s870_s13, 256 }
  0x70   : > { %655 = vmatpush3.bf16.msra.mxu0 %v764_v2  ;;  %675 = vmatpush3.bf16.msra.mxu1 %v772_v6  ;;  %v612_v19 = vld [vmem:[%s1219_s2] ss:$0 sm:$0xff]  ;;  %p872_p7 = scmp.lt.s32.totalorder %s1175_s7, %s870_s13  ;;  %p873_p9 = scmp.lt.s32.totalorder %s871_s29, %s865_s16 }
  0x71   : > { %656 = vmatprep.subr.bf16.mxu0 %v942_v0  ;;  %676 = vmatprep.subr.bf16.mxu1 %v942_v0  ;;  %v621_v27 = vld [vmem:[%s1221_s4] ss:$0 sm:$0xff]  ;;  %p868_p3 = pneg %p867_p1 }
  0x72   : > { %p874_p12 = por %p873_p9, %p872_p7 }
  0x74   : > { %657 = vmatpush3.bf16.msra.mxu0 %v765_v3  ;;  %677 = vmatpush3.bf16.msra.mxu1 %v773_v8  ;;  %p875_p2 = pnand %p874_p12, %p868_p3 }
  0x75   : > { %658 = vmatprep.subr.bf16.mxu0 %v942_v0  ;;  %678 = vmatprep.subr.bf16.mxu1 %v942_v0 }
  0x78   : > { %659 = vmatpush3.bf16.msra.mxu0 %v766_v5  ;;  %679 = vmatpush3.bf16.msra.mxu1 %v774_v10 }
  0x79   : > { %660 = vmatprep.subr.bf16.mxu0 %v942_v0  ;;  %680 = vmatprep.subr.bf16.mxu1 %v942_v0 }
  0x7c   : > { %661 = vmatpush3.bf16.msra.mxu0 %v767_v7  ;;  %681 = vmatpush3.bf16.msra.mxu1 %v775_v12 }
  0x7d   : > { %662 = vmatprep.subr.bf16.mxu0 %v942_v0  ;;  %682 = vmatprep.subr.bf16.mxu1 %v942_v0 }
  0x80   : > { %663 = vmatpush3.bf16.msra.mxu0 %v768_v9  ;;  %683 = vmatpush3.bf16.msra.mxu1 %v776_v15 }
  0x81   : > { %664 = vmatprep.subr.bf16.mxu0 %v942_v0  ;;  %684 = vmatprep.subr.bf16.mxu1 %v942_v0 }
  0x84   : > { %665 = vmatpush3.bf16.msra.mxu0 %v769_v11  ;;  %685 = vmatpush3.bf16.msra.mxu1 %v777_v17 }
  0x85   : > { %666 = vmatprep.subr.bf16.mxu0 %v942_v0  ;;  %686 = vmatprep.subr.bf16.mxu1 %v942_v0 }
  0x88   : > { %667 = vmatpush3.bf16.msra.mxu0 %v770_v13  ;;  %687 = vmatpush3.bf16.msra.mxu1 %v778_v18 }
  0x8b   : > { %669 = vmatmul.mubr.bf16.vlgmr.msra.gmra.mrb[0].mxu0 %v271_v16 }
 0x15e   : > { %v377_v20 = vpop.f32.mrb[0].mxu0 }
 0x15f   : > { %v378_v21 = vadd.f32 %v612_v19, %v377_v20  ;;  %v670_v22 = vpop.f32.mrb[1].mxu0 }
 0x160   : > { %v380_v23 = vpop.f32.mrb[2].mxu0 }
 0x161   : > { %v383_v24 = vmax.f32 %v378_v21, 0.0  ;;  %v671_v25 = vpop.f32.mrb[3].mxu0 }
 0x163   : > { %v384_v26 = vpack.c.bf16 %v383_v24, %v383_v24 }
 0x165   : > { %689 = vmatmul.mubr.bf16.vlgmr.msra.gmra.mrb[0].mxu1 %v384_v26 }
 0x238   : > { %v490_v28 = vpop.f32.mrb[0].mxu1 }
 0x239   : > { %v491_v29 = vadd.f32 %v621_v27, %v490_v28  ;;  %v690_v30 = vpop.f32.mrb[1].mxu1 }
 0x23a   : > { %v493_v31 = vpop.f32.mrb[2].mxu1 }
 0x23b   : > { %496 = vst [vmem:[%s268_s28] sm:$0xff] %v491_v29  ;;  %v691_v32 = vpop.f32.mrb[3].mxu1 }
 0x23c   : > { %878 = shalt.err (!%p875_p2)
}
 0x23d   : > { %s879_s12 = scalar_lea.hbm %s1173_s15, 128  ;;  %s883_s26 = scalar_lea.hbm %s1222_s5, 256 }
 0x23e   : > { %p880_p13 = scmp.ne.s32.totalorder %s1173_s15, %s879_s12  ;;  %p884_p4 = scmp.lt.u32.totalorder %s1173_s15, %s1222_s5 }
 0x23f   : > { %p885_p5 = scmp.lt.u32.totalorder %s883_s26, %s879_s12  ;;  %p887_p11 = scmp.lt.u32.totalorder %s879_s12, %s1173_s15 }
 0x240   : > { %p881_p6 = pnand %p880_p13, %p1236_p0 }
 0x241   : > { %p886_p8 = por %p885_p5, %p884_p4 }
 0x242   : > { %p882_p10 = pneg %p881_p6 }
 0x243   : > { %p888_p1 = por %p887_p11, %p886_p8 }
 0x245   : > { %p889_p3 = pnand %p888_p1, %p882_p10 }
 0x247   : > { %892 = shalt.err (!%p889_p3)
}
 0x248   : > { %702 = dma.vmem_to_hbm [thread:$0]  (%p1236_p0), %s1175_s7, 128, %s1173_s15, %s498_s22  }
 0x249 PF: > { %s523_s11 = sand.u32 1, %s923_s18   ;;  %p1237_p7 = scmp.ne.s32.totalorder %s1227_s25, 0 }
 0x24a   : > { %p1238_p9 = scmp.ge.s32.totalorder %s935_s21, 2  ;;  %s524_s28 = scalar_lea.sflag [#allocation4], %s523_s11 }
 0x24c   : > { %p716_p12 = pnand %p1238_p9, %p1237_p7 }
 0x24e   : > { %918 = dma.done.wait (!%p716_p12), %s524_s28, 128  }
 0x24f   : > { %920 = vsyncadd (!%p716_p12), %s524_s28, 4294967168  ;;  %p19_p2 = scmp.ge.s32.totalorder %s1085_s14, 4   ;;  %s1239_s18 = smov %s927_s19 }
 0x250   : > { %s1240_s19 = smov %s931_s20  ;;  %s1241_s20 = smov %s1101_s27 }
 0x251   : > { %s1242_s21 = smov %s1085_s14  ;;  %21 = sbr.rel (!%p19_p2) target bundleno = 6 (0x6), region = 93 }
 0x258   :  { %529 = vsyncpa [#allocation3], 1 }
 0x259   :  { %531 = vsyncpa [#allocation3 + $0x1], 1 }
 0x25a   :  { %532 = vsyncpa [#allocation6], 1 }
 0x25b   :  { %533 = vsyncpa [#allocation4], 1 }
 0x25c   :  { %535 = vsyncpa [#allocation4 + $0x1], 1 }

// kernel: tpu_custom_call.1
= control target key start
LH: loop header
LB: loop body
LE: loop exit
PB: predicated region body
PF: predicated region fallthrough
CT: control target
= control target key end

     0   :  { %10 = vsyncpa [#allocation3], 0  ;;  %s1217_s0 = inlined_call_operand.hbm [shape: f32[16,128], index: 0, kind: input, shape index: {}]   ;;  %s1218_s1 = inlined_call_operand.hbm [shape: bf16[128,128], index: 1, kind: input, shape index: {}]   ;;  %s1219_s2 = inlined_call_operand.vmem [shape: f32[1,128], index: 2, kind: input, shape index: {}]   ;;  %s1220_s3 = inlined_call_operand.hbm [shape: bf16[128,128], index: 3, kind: input, shape index: {}]   ;;  %s1221_s4 = inlined_call_operand.vmem [shape: f32[1,128], index: 4, kind: input, shape index: {}]   ;;  %s1222_s5 = inlined_call_operand.hbm [shape: f32[16,128], index: 5, kind: output, shape index: {}]  }
   0x1   :  { %12 = vsyncpa [#allocation3 + $0x1], 0 }
   0x2   :  { %13 = vsyncpa [#allocation6], 0 }
   0x3   :  { %14 = vsyncpa [#allocation4], 0 }
   0x4   :  { %16 = vsyncpa [#allocation4 + $0x1], 0  ;;  %s975_s18 = smov 0   ;;  %s977_s19 = smov 0  }
   0x5   :  { %s979_s20 = smov 0   ;;  %s981_s21 = smov 0  }
   0x6 LB: > { %s996_s22 = sadd.s32 4294967295, %s935_s21   ;;  %s600_s23 = sadd.s32 4294967294, %s935_s21   ;;  %s935_s21 = sphi %s981_s21, %s1242_s21   ;;  %s931_s20 = sphi %s979_s20, %s1241_s20   ;;  %s927_s19 = sphi %s977_s19, %s1240_s19   ;;  %s923_s18 = sphi %s975_s18, %s1239_s18  }
   0x7   : > { %p42_p0 = scmp.ne.s32.totalorder %s927_s19, %s923_s18  ;;  %p1223_p1 = scmp.eq.s32.totalorder %s996_s22, 0 }
   0x8   : > { %p156_p3 = scmp.eq.s32.totalorder %s600_s23, 1  ;;  %p601_p5 = scmp.ge.s32.totalorder %s935_s21, 1 }
   0x9   : > { %p1005_p4 = por %p1223_p1, %p42_p0  ;;  %p163_p7 = scmp.lt.s32.totalorder %s935_s21, 3 }
   0xa   : > { %p1010_p6 = por %p156_p3, %p42_p0  ;;  %s937_s27 = smov [#allocation5]  }
   0xb   : > { %s1226_s24 = scalar_select %p1005_p4, 1, 0 }
   0xc   : > { %s1227_s25 = scalar_select %p1010_p6, 1, 0 }
   0xd   : > { %p1015_p8 = pnand %p601_p5, %p163_p7  ;;  %s175_s28 = sshll.u32 %s937_s27, 4  ;;  %s1019_s28 = int_to_ptr.vmem [resolvable:$true] %s175_s28 }
   0xe   : > { %s938_s30 = smov [#allocation7]   ;;  %s779_s9 = scalar_lea.hbm %s1218_s1, 1024 }
   0xf   : > { %p704_p9 = pneg %p1015_p8  ;;  %s191_s6 = sshll.u32 %s938_s30, 4  ;;  %s1030_s6 = int_to_ptr.vmem [resolvable:$true] %s191_s6 }
  0x10   : > { %p780_p12 = scmp.ne.s32.totalorder %s1218_s1, %s779_s9  ;;  %p786_p5 = scmp.lt.u32.totalorder %s779_s9, %s1218_s1 }
  0x11   : > { %p1026_p11 = pnand %p704_p9, %p1223_p1 }
  0x13   : > { %p781_p13 = pneg %p1026_p11 }
  0x15   : > { %p782_p0 = pnand %p781_p13, %p780_p12 }
  0x17   : > { %p783_p3 = pneg %p782_p0 }
  0x19   : > { %p788_p7 = pnand %p786_p5, %p783_p3 }
  0x1b   : > { %791 = shalt.err (!%p788_p7)
}
  0x1c   : > { %s792_s14 = scalar_lea.vmem %s1019_s28, 1024  ;;  %p800_p2 = scmp.lt.s32.totalorder %s1019_s28, %s1019_s28 }
  0x1d   : > { %p793_p9 = scmp.ne.s32.totalorder %s1019_s28, %s792_s14  ;;  %p801_p12 = scmp.lt.s32.totalorder %s792_s14, %s792_s14 }
  0x1f   : > { %p795_p10 = pnand %p793_p9, %p781_p13  ;;  %p802_p0 = por %p801_p12, %p800_p2 }
  0x21   : > { %p796_p1 = pneg %p795_p10 }
  0x23   : > { %p803_p6 = pnand %p802_p0, %p796_p1 }
  0x25   : > { %806 = shalt.err (!%p803_p6)
}
  0x26   : > { %s939_s15 = smov 64   ;;  %s940_s16 = smov 4  }
  0x27   : > { %707 = dma.hbm_to_vmem [thread:$0]  (!%p1026_p11), %s1218_s1, 1024, %s1019_s28, [#allocation6], %s939_s15, %s939_s15, %s940_s16  }
  0x28   : > { %s807_s7 = scalar_lea.hbm %s1220_s3, 1024 }
  0x29   : > { %p808_p2 = scmp.ne.s32.totalorder %s1220_s3, %s807_s7  ;;  %p814_p10 = scmp.lt.u32.totalorder %s807_s7, %s1220_s3 }
  0x2b   : > { %p810_p1 = pnand %p808_p2, %p781_p13 }
  0x2d   : > { %p811_p6 = pneg %p810_p1 }
  0x2f   : > { %p816_p3 = pnand %p814_p10, %p811_p6 }
  0x31   : > { %819 = shalt.err (!%p816_p3)
}
  0x32   : > { %s820_s28 = scalar_lea.vmem %s1030_s6, 1024  ;;  %p828_p12 = scmp.lt.s32.totalorder %s1030_s6, %s1030_s6 }
  0x33   : > { %p821_p5 = scmp.ne.s32.totalorder %s1030_s6, %s820_s28  ;;  %p829_p0 = scmp.lt.s32.totalorder %s820_s28, %s820_s28 }
  0x35   : > { %p823_p7 = pnand %p821_p5, %p781_p13  ;;  %p830_p2 = por %p829_p0, %p828_p12 }
  0x37   : > { %p824_p9 = pneg %p823_p7 }
  0x39   : > { %p831_p1 = pnand %p830_p2, %p824_p9 }
  0x3b   : > { %834 = shalt.err (!%p831_p1)
}
  0x3c   : > { %710 = dma.hbm_to_vmem [thread:$0]  (!%p1026_p11), %s1220_s3, 1024, %s1030_s6, [#allocation6], %s939_s15, %s939_s15, %s940_s16  }
  0x3d   : > { %s1085_s14 = sadd.s32 1, %s935_s21   ;;  %s29_s29 = sadd.s32 1, %s931_s20 }
  0x3e   : > { %s26_s17 = ssub.s32 %s935_s21, %s1085_s14  ;;  %p36_p13 = scmp.ne.s32.totalorder %s931_s20, %s927_s19 }
  0x3f   : > { %p27_p6 = scmp.eq.s32.totalorder %s26_s17, 0  ;;  %p37_p10 = scmp.eq.s32.totalorder %s935_s21, 0 }
  0x40   : > { %p1230_p3 = scmp.eq.s32.totalorder %s996_s22, 1  ;;  %p721_p7 = scmp.lt.s32.totalorder %s935_s21, 2 }
  0x41   : > { %s1101_s27 = scalar_select %p27_p6, %s931_s20, %s29_s29  }
  0x42   : > { %p1095_p5 = por %p1230_p3, %p36_p13  ;;  %p38_p9 = por %p37_p10, %p36_p13 }
  0x43   : > { %s208_s30 = sand.u32 1, %s931_s20   ;;  %s606_s6 = sshll.u32 %s935_s21, 7 }
  0x44   : > { %s1231_s23 = scalar_select %p1095_p5, 1, 0 }
  0x45   : > { %s605_s7 = sshll.u32 %s208_s30, 3  ;;  %s1108_s8 = scalar_lea.hbm %s1217_s0, %s606_s6 }
  0x46   : > { %s212_s9 = scalar_lea.vmem [#allocation2], %s605_s7  ;;  %p1112_p11 = pnand %p721_p7, %p38_p9 }
  0x47   : > { %s219_s10 = sshll.u32 %s212_s9, 4  ;;  %s209_s28 = scalar_lea.sflag [#allocation3], %s208_s30  ;;  %s1110_s10 = int_to_ptr.vmem [resolvable:$true] %s219_s10 }
  0x48   : > { %s835_s12 = scalar_lea.hbm %s1108_s8, 128  ;;  %p837_p0 = pneg %p1112_p11 }
  0x49   : > { %p836_p12 = scmp.ne.s32.totalorder %s1108_s8, %s835_s12  ;;  %s840_s17 = scalar_lea.hbm %s1217_s0, 256 }
  0x4a   : > { %p841_p13 = scmp.lt.u32.totalorder %s1108_s8, %s1217_s0  ;;  %p842_p6 = scmp.lt.u32.totalorder %s840_s17, %s835_s12 }
  0x4b   : > { %p838_p2 = pnand %p837_p0, %p836_p12  ;;  %p844_p3 = scmp.lt.u32.totalorder %s835_s12, %s1108_s8 }
  0x4c   : > { %p843_p10 = por %p842_p6, %p841_p13 }
  0x4d   : > { %p839_p1 = pneg %p838_p2 }
  0x4e   : > { %p845_p7 = por %p844_p3, %p843_p10 }
  0x50   : > { %p846_p9 = pnand %p845_p7, %p839_p1 }
  0x52   : > { %849 = shalt.err (!%p846_p9)
}
  0x53   : > { %s850_s30 = scalar_lea.vmem %s1110_s10, 128  ;;  %s941_s15 = smov [#allocation2]  }
  0x54   : > { %p851_p12 = scmp.ne.s32.totalorder %s1110_s10, %s850_s30  ;;  %s855_s16 = sshll.u32 %s941_s15, 4  ;;  %s856_s16 = int_to_ptr.vmem [resolvable:$false] %s855_s16 }
  0x55   : > { %s857_s9 = scalar_lea.vmem %s856_s16, 256  ;;  %p858_p4 = scmp.lt.s32.totalorder %s1110_s10, %s856_s16 }
  0x56   : > { %p853_p2 = pnand %p851_p12, %p837_p0  ;;  %p859_p13 = scmp.lt.s32.totalorder %s857_s9, %s850_s30 }
  0x58   : > { %p854_p5 = pneg %p853_p2  ;;  %p860_p6 = por %p859_p13, %p858_p4 }
  0x5a   : > { %p861_p10 = pnand %p860_p6, %p854_p5 }
  0x5c   : > { %864 = shalt.err (!%p861_p10)
}
  0x5d   : > { %714 = dma.hbm_to_vmem [thread:$0]  (!%p1112_p11), %s1108_s8, 128, %s1110_s10, %s209_s28  }
  0x5e   : > { %228 = sbr.rel (%p1015_p8) target bundleno = 585 (0x249), region = 40  ;;  %s1144_s12 = sand.u32 (!%p1015_p8), 1, %s927_s19  }
  0x5f   : > { %s608_s13 = sshll.u32 (!%p1015_p8), %s1144_s12, 3  ;;  %s231_s29 = scalar_lea.sflag (!%p1015_p8), [#allocation3], %s1144_s12 }
  0x60   : > { %s1150_s17 = scalar_lea.vmem (!%p1015_p8), [#allocation2], %s608_s13  ;;  %p1233_p4 = scmp.ne.s32.totalorder (!%p1015_p8), %s1226_s24, 0 }
  0x65   : > { %910 = dma.done.wait (%p1233_p4), %s231_s29, 128  }
  0x66   : > { %912 = vsyncadd (%p1233_p4), %s231_s29, 4294967168  ;;  %p1234_p5 = scmp.eq.s32.totalorder %s996_s22, 0 }
  0x68   : > { %914 = dma.done.wait (%p1234_p5), [#allocation6], 2048   ;;  %p1235_p8 = pmov %p1234_p5 }
  0x69   : > { %v942_v0 = vmov 0.0   ;;  %vm943_vm0 = vmmov 0   ;;  %v763_v1 = vld [vmem:[#allocation5] sm:$0xff]   ;;  %v764_v2 = vld [vmem:[#allocation5 + $0x8] sm:$0xff]   ;;  %v765_v3 = vld [vmem:[#allocation5 + $0x10] sm:$0xff]   ;;  %s631_s11 = sshll.u32 %s996_s22, 7 }
  0x6a   : > { %916 = vsyncadd (%p1235_p8), [#allocation6], 4294965248  ;;  %652 = vmatprep.subr.bf16.mxu0 %v942_v0  ;;  %668 = vmatprep.mubr.msk.bf16.mxu0 %vm943_vm0, %v942_v0  ;;  %v771_v4 = vld [vmem:[#allocation7] sm:$0xff]   ;;  %v766_v5 = vld [vmem:[#allocation5 + $0x18] sm:$0xff]   ;;  %s268_s28 = scalar_lea.vmem [#allocation8], %s608_s13  ;;  %s1173_s15 = scalar_lea.hbm %s1222_s5, %s631_s11 }
  0x6b   : > { %672 = vmatprep.subr.bf16.mxu1 %v942_v0  ;;  %688 = vmatprep.mubr.msk.bf16.mxu1 %vm943_vm0, %v942_v0  ;;  %v772_v6 = vld [vmem:[#allocation7 + $0x8] sm:$0xff]   ;;  %v767_v7 = vld [vmem:[#allocation5 + $0x20] sm:$0xff]   ;;  %v773_v8 = vld [vmem:[#allocation7 + $0x10] sm:$0xff]   ;;  %s511_s7 = sshll.u32 %s268_s28, 4  ;;  %s498_s22 = scalar_lea.sflag [#allocation4], %s1144_s12  ;;  %s1175_s7 = int_to_ptr.vmem [resolvable:$true] %s511_s7 }
  0x6c   : > { %653 = vmatpush3.bf16.msra.mxu0 %v763_v1  ;;  %673 = vmatpush3.bf16.msra.mxu1 %v771_v4  ;;  %v768_v9 = vld [vmem:[#allocation5 + $0x28] sm:$0xff]   ;;  %v774_v10 = vld [vmem:[#allocation7 + $0x18] sm:$0xff]   ;;  %v769_v11 = vld [vmem:[#allocation5 + $0x30] sm:$0xff]   ;;  %s865_s16 = scalar_lea.vmem %s1175_s7, 128  ;;  %p1236_p0 = scmp.ne.s32.totalorder %s1231_s23, 0 }
  0x6d   : > { %654 = vmatprep.subr.bf16.mxu0 %v942_v0  ;;  %674 = vmatprep.subr.bf16.mxu1 %v942_v0  ;;  %v775_v12 = vld [vmem:[#allocation7 + $0x20] sm:$0xff]   ;;  %v770_v13 = vld [vmem:[#allocation5 + $0x38] sm:$0xff]   ;;  %v776_v15 = vld [vmem:[#allocation7 + $0x28] sm:$0xff]   ;;  %p866_p11 = scmp.ne.s32.totalorder %s1175_s7, %s865_s16  ;;  %s944_s9 = smov [#allocation8]  }
  0x6e   : > { %v270_v14 = vld [vmem:[%s1150_s17] sm:$0xff]  ;;  %s869_s13 = sshll.u32 %s944_s9, 4  ;;  %s870_s13 = int_to_ptr.vmem [resolvable:$false] %s869_s13 }
  0x6f   : > { %v271_v16 = vpack.c.bf16 %v270_v14, %v270_v14  ;;  %v777_v17 = vld [vmem:[#allocation7 + $0x30] sm:$0xff]   ;;  %v778_v18 = vld [vmem:[#allocation7 + $0x38] sm:$0xff]   ;;  %p867_p1 = pnand %p866_p11, %p1236_p0  ;;  %s871_s29 = scalar_lea.vmem %s870_s13, 256 }
  0x70   : > { %655 = vmatpush3.bf16.msra.mxu0 %v764_v2  ;;  %675 = vmatpush3.bf16.msra.mxu1 %v772_v6  ;;  %v612_v19 = vld [vmem:[%s1219_s2] ss:$0 sm:$0xff]  ;;  %p872_p7 = scmp.lt.s32.totalorder %s1175_s7, %s870_s13  ;;  %p873_p9 = scmp.lt.s32.totalorder %s871_s29, %s865_s16 }
  0x71   : > { %656 = vmatprep.subr.bf16.mxu0 %v942_v0  ;;  %676 = vmatprep.subr.bf16.mxu1 %v942_v0  ;;  %v621_v27 = vld [vmem:[%s1221_s4] ss:$0 sm:$0xff]  ;;  %p868_p3 = pneg %p867_p1 }
  0x72   : > { %p874_p12 = por %p873_p9, %p872_p7 }
  0x74   : > { %657 = vmatpush3.bf16.msra.mxu0 %v765_v3  ;;  %677 = vmatpush3.bf16.msra.mxu1 %v773_v8  ;;  %p875_p2 = pnand %p874_p12, %p868_p3 }
  0x75   : > { %658 = vmatprep.subr.bf16.mxu0 %v942_v0  ;;  %678 = vmatprep.subr.bf16.mxu1 %v942_v0 }
  0x78   : > { %659 = vmatpush3.bf16.msra.mxu0 %v766_v5  ;;  %679 = vmatpush3.bf16.msra.mxu1 %v774_v10 }
  0x79   : > { %660 = vmatprep.subr.bf16.mxu0 %v942_v0  ;;  %680 = vmatprep.subr.bf16.mxu1 %v942_v0 }
  0x7c   : > { %661 = vmatpush3.bf16.msra.mxu0 %v767_v7  ;;  %681 = vmatpush3.bf16.msra.mxu1 %v775_v12 }
  0x7d   : > { %662 = vmatprep.subr.bf16.mxu0 %v942_v0  ;;  %682 = vmatprep.subr.bf16.mxu1 %v942_v0 }
  0x80   : > { %663 = vmatpush3.bf16.msra.mxu0 %v768_v9  ;;  %683 = vmatpush3.bf16.msra.mxu1 %v776_v15 }
  0x81   : > { %664 = vmatprep.subr.bf16.mxu0 %v942_v0  ;;  %684 = vmatprep.subr.bf16.mxu1 %v942_v0 }
  0x84   : > { %665 = vmatpush3.bf16.msra.mxu0 %v769_v11  ;;  %685 = vmatpush3.bf16.msra.mxu1 %v777_v17 }
  0x85   : > { %666 = vmatprep.subr.bf16.mxu0 %v942_v0  ;;  %686 = vmatprep.subr.bf16.mxu1 %v942_v0 }
  0x88   : > { %667 = vmatpush3.bf16.msra.mxu0 %v770_v13  ;;  %687 = vmatpush3.bf16.msra.mxu1 %v778_v18 }
  0x8b   : > { %669 = vmatmul.mubr.bf16.vlgmr.msra.gmra.mrb[0].mxu0 %v271_v16 }
 0x15e   : > { %v377_v20 = vpop.f32.mrb[0].mxu0 }
 0x15f   : > { %v378_v21 = vadd.f32 %v612_v19, %v377_v20  ;;  %v670_v22 = vpop.f32.mrb[1].mxu0 }
 0x160   : > { %v380_v23 = vpop.f32.mrb[2].mxu0 }
 0x161   : > { %v383_v24 = vmax.f32 %v378_v21, 0.0  ;;  %v671_v25 = vpop.f32.mrb[3].mxu0 }
 0x163   : > { %v384_v26 = vpack.c.bf16 %v383_v24, %v383_v24 }
 0x165   : > { %689 = vmatmul.mubr.bf16.vlgmr.msra.gmra.mrb[0].mxu1 %v384_v26 }
 0x238   : > { %v490_v28 = vpop.f32.mrb[0].mxu1 }
 0x239   : > { %v491_v29 = vadd.f32 %v621_v27, %v490_v28  ;;  %v690_v30 = vpop.f32.mrb[1].mxu1 }
 0x23a   : > { %v493_v31 = vpop.f32.mrb[2].mxu1 }
 0x23b   : > { %496 = vst [vmem:[%s268_s28] sm:$0xff] %v491_v29  ;;  %v691_v32 = vpop.f32.mrb[3].mxu1 }
 0x23c   : > { %878 = shalt.err (!%p875_p2)
}
 0x23d   : > { %s879_s12 = scalar_lea.hbm %s1173_s15, 128  ;;  %s883_s26 = scalar_lea.hbm %s1222_s5, 256 }
 0x23e   : > { %p880_p13 = scmp.ne.s32.totalorder %s1173_s15, %s879_s12  ;;  %p884_p4 = scmp.lt.u32.totalorder %s1173_s15, %s1222_s5 }
 0x23f   : > { %p885_p5 = scmp.lt.u32.totalorder %s883_s26, %s879_s12  ;;  %p887_p11 = scmp.lt.u32.totalorder %s879_s12, %s1173_s15 }
 0x240   : > { %p881_p6 = pnand %p880_p13, %p1236_p0 }
 0x241   : > { %p886_p8 = por %p885_p5, %p884_p4 }
 0x242   : > { %p882_p10 = pneg %p881_p6 }
 0x243   : > { %p888_p1 = por %p887_p11, %p886_p8 }
 0x245   : > { %p889_p3 = pnand %p888_p1, %p882_p10 }
 0x247   : > { %892 = shalt.err (!%p889_p3)
}
 0x248   : > { %702 = dma.vmem_to_hbm [thread:$0]  (%p1236_p0), %s1175_s7, 128, %s1173_s15, %s498_s22  }
 0x249 PF: > { %s523_s11 = sand.u32 1, %s923_s18   ;;  %p1237_p7 = scmp.ne.s32.totalorder %s1227_s25, 0 }
 0x24a   : > { %p1238_p9 = scmp.ge.s32.totalorder %s935_s21, 2  ;;  %s524_s28 = scalar_lea.sflag [#allocation4], %s523_s11 }
 0x24c   : > { %p716_p12 = pnand %p1238_p9, %p1237_p7 }
 0x24e   : > { %918 = dma.done.wait (!%p716_p12), %s524_s28, 128  }
 0x24f   : > { %920 = vsyncadd (!%p716_p12), %s524_s28, 4294967168  ;;  %p19_p2 = scmp.ge.s32.totalorder %s1085_s14, 4   ;;  %s1239_s18 = smov %s927_s19 }
 0x250   : > { %s1240_s19 = smov %s931_s20  ;;  %s1241_s20 = smov %s1101_s27 }
 0x251   : > { %s1242_s21 = smov %s1085_s14  ;;  %21 = sbr.rel (!%p19_p2) target bundleno = 6 (0x6), region = 93 }
 0x258   :  { %529 = vsyncpa [#allocation3], 1 }
 0x259   :  { %531 = vsyncpa [#allocation3 + $0x1], 1 }
 0x25a   :  { %532 = vsyncpa [#allocation6], 1 }
 0x25b   :  { %533 = vsyncpa [#allocation4], 1 }
 0x25c   :  { %535 = vsyncpa [#allocation4 + $0x1], 1 }

</bundles_post_ra>
